<compile_context>
chip_gen: v7x
topology: tpu7x:2x2x1
jax: 0.10.0
libtpu: 0.0.40
codegen_flags: <defaults>
</compile_context>

<pallas_src>
import functools

import jax
import jax.numpy as jnp
from jax import lax
from jax.experimental import pallas as pl
from jax.experimental.pallas import tpu as pltpu

_LANE = 128


def _round_up(n: int, m: int) -> int:
    return ((n + m - 1) // m) * m


def _pad2(a, rows: int, cols: int):
    return jnp.pad(a, ((0, rows - a.shape[0]), (0, cols - a.shape[1])))


def _value_net_kernel(x_ref, w1_ref, b1_ref, w2_ref, b2_ref, w3t_ref, b3_ref,
                      out_ref):
    """Fused MLP tile: relu(relu(x@W1+b1)@W2+b2)@W3+b3 for one batch tile."""
    x = x_ref[...]                                                  # (TB, S_pad) bf16

    h1 = jnp.dot(x, w1_ref[...], preferred_element_type=jnp.float32)
    h1 = jnp.maximum(h1 + b1_ref[...], 0.0)                         # (TB, H_pad) f32

    h2 = jnp.dot(h1.astype(jnp.bfloat16), w2_ref[...],
                 preferred_element_type=jnp.float32)
    h2 = jnp.maximum(h2 + b2_ref[...], 0.0)                         # (TB, H_pad) f32

    # Final layer as W3^T (1, H_pad) contracted with h2 (TB, H_pad) over H:
    # directly yields a lane-dense (1, TB) row -> unmasked full-width store.
    v = lax.dot_general(w3t_ref[...], h2.astype(jnp.bfloat16),
                        dimension_numbers=(((1,), (1,)), ((), ())),
                        preferred_element_type=jnp.float32)          # (1, TB) f32

    out_ref[...] = (v + b3_ref[0, 0]).astype(out_ref.dtype)


@functools.partial(jax.jit, static_argnames=("block_b",))
def value_network_forward(x, params, *, block_b: int = 1024):
    """x: (B, state_size) float32. Returns (B,) float32 (matches .squeeze(-1))."""
    w1, b1, w2, b2, w3, b3 = params
    B, S = x.shape
    H = w1.shape[1]

    # Lane-pad feature dims; tile the batch with lane-dense tiles (multiple of 128).
    S_pad = _round_up(S, _LANE)
    H_pad = _round_up(H, _LANE)
    TB = min(block_b, _round_up(B, _LANE))
    B_pad = _round_up(B, TB)
    num_tiles = B_pad // TB

    # Zero-padding is exact: padded x cols hit zero W1 rows, padded hidden cols get
    # zero weight + zero bias -> relu(0)=0 -> zero contribution downstream.
    x_p = _pad2(x, B_pad, S_pad).astype(jnp.bfloat16)
    w1_p = _pad2(w1, S_pad, H_pad).astype(jnp.bfloat16)
    b1_p = _pad2(b1, 1, H_pad).astype(jnp.float32)
    w2_p = _pad2(w2, H_pad, H_pad).astype(jnp.bfloat16)
    b2_p = _pad2(b2, 1, H_pad).astype(jnp.float32)
    w3t_p = _pad2(w3.T, 1, H_pad).astype(jnp.bfloat16)               # (1, H_pad)
    b3_p = b3.reshape(1, 1).astype(jnp.float32)                      # scalar -> SMEM

    flops = 2 * B_pad * (S_pad * H_pad + H_pad * H_pad + H_pad)
    bytes_accessed = (B_pad * S_pad * 2                              # x (bf16)
                      + (S_pad * H_pad + H_pad * H_pad + H_pad) * 2  # weights (bf16)
                      + (2 * H_pad + 1) * 4                          # biases (f32)
                      + B_pad * 4)                                   # output (f32)

    out = pl.pallas_call(
        _value_net_kernel,
        out_shape=jax.ShapeDtypeStruct((num_tiles, TB), jnp.float32),
        grid=(num_tiles,),
        in_specs=[
            pl.BlockSpec((TB, S_pad), lambda i: (i, 0)),             # x: streamed tiles
            pl.BlockSpec((S_pad, H_pad), lambda i: (0, 0)),          # W1: VMEM-resident
            pl.BlockSpec((1, H_pad), lambda i: (0, 0)),              # b1
            pl.BlockSpec((H_pad, H_pad), lambda i: (0, 0)),          # W2
            pl.BlockSpec((1, H_pad), lambda i: (0, 0)),              # b2
            pl.BlockSpec((1, H_pad), lambda i: (0, 0)),              # W3^T
            pl.BlockSpec(memory_space=pltpu.MemorySpace.SMEM),       # b3 scalar
        ],
        out_specs=pl.BlockSpec((1, TB), lambda i: (i, 0)),           # lane-dense rows
        compiler_params=pltpu.CompilerParams(
            dimension_semantics=("parallel",)),
        cost_estimate=pl.CostEstimate(flops=flops, transcendentals=0,
                                      bytes_accessed=bytes_accessed),
    )(x_p, w1_p, b1_p, w2_p, b2_p, w3t_p, b3_p)

    return out.reshape(B_pad)[:B]                                    # squeeze(-1)


def init_params(key, state_size, hidden_size=64):
    """PyTorch-Linear-style init (uniform +-1/sqrt(fan_in)); weights stored (in, out)."""
    ks = jax.random.split(key, 6)

    def lin(kw, kb, fan_in, fan_out):
        bound = 1.0 / jnp.sqrt(float(fan_in))
        w = jax.random.uniform(kw, (fan_in, fan_out), jnp.float32, -bound, bound)
        b = jax.random.uniform(kb, (1, fan_out), jnp.float32, -bound, bound)
        return w, b

    w1, b1 = lin(ks[0], ks[1], state_size, hidden_size)
    w2, b2 = lin(ks[2], ks[3], hidden_size, hidden_size)
    w3, b3 = lin(ks[4], ks[5], hidden_size, 1)
    return (w1, b1, w2, b2, w3, b3)


if __name__ == "__main__":
    key = jax.random.PRNGKey(0)
    k_x, k_p = jax.random.split(key)

    B, STATE_SIZE, HIDDEN = 8, 8, 32
    x = jax.random.normal(k_x, (B, STATE_SIZE), dtype=jnp.float32)
    params = init_params(k_p, STATE_SIZE, HIDDEN)

    out = value_network_forward(x, params)
    jax.block_until_ready(out)

    # Pure-JAX f32 reference of the same math (kernel runs bf16 matmuls w/ f32 acc).
    w1, b1, w2, b2, w3, b3 = params
    ref = jnp.maximum(x @ w1 + b1, 0.0)
    ref = jnp.maximum(ref @ w2 + b2, 0.0)
    ref = (ref @ w3 + b3)[:, 0]

    assert out.shape == (B,)
    assert jnp.allclose(out, ref, atol=3e-2, rtol=3e-2), (
        f"max abs err {jnp.max(jnp.abs(out - ref))}")

    print("KERNEL_OK")
</pallas_src>

<mosaic_0001>
module attributes {stable_mosaic.version = 11 : i64} {
  func.func @_value_net_kernel(%arg0: i32, %arg1: memref<128x128xbf16, #tpu.memory_space<vmem>>, %arg2: memref<128x128xbf16, #tpu.memory_space<vmem>>, %arg3: memref<1x128xf32, #tpu.memory_space<vmem>>, %arg4: memref<128x128xbf16, #tpu.memory_space<vmem>>, %arg5: memref<1x128xf32, #tpu.memory_space<vmem>>, %arg6: memref<1x128xbf16, #tpu.memory_space<vmem>>, %arg7: memref<1x1xf32, #tpu.memory_space<smem>>, %arg8: memref<1x128xf32, #tpu.memory_space<vmem>>) attributes {dimension_semantics = [#tpu.dimension_semantics<parallel>], iteration_bounds = array<i64: 1>, scalar_prefetch = 0 : i64, scratch_operands = 0 : i64, tpu.core_type = #tpu.core_type<tc>, window_params = [{transform_indices = @transform_0, window_bounds = array<i64: 128, 128>}, {pipeline_mode = #tpu.pipeline_mode<synchronous>, transform_indices = @transform_1, window_bounds = array<i64: 128, 128>}, {pipeline_mode = #tpu.pipeline_mode<synchronous>, transform_indices = @transform_2, window_bounds = array<i64: 1, 128>}, {pipeline_mode = #tpu.pipeline_mode<synchronous>, transform_indices = @transform_3, window_bounds = array<i64: 128, 128>}, {pipeline_mode = #tpu.pipeline_mode<synchronous>, transform_indices = @transform_4, window_bounds = array<i64: 1, 128>}, {pipeline_mode = #tpu.pipeline_mode<synchronous>, transform_indices = @transform_5, window_bounds = array<i64: 1, 128>}, {transform_indices = @transform_6, window_bounds = array<i64: 1, 1>}, {transform_indices = @transform_7, window_bounds = array<i64: 1, 128>}]} {
    %c0 = arith.constant 0 : index
    %c0_0 = arith.constant 0 : index
    %0 = vector.load %arg1[%c0, %c0_0] : memref<128x128xbf16, #tpu.memory_space<vmem>>, vector<128x128xbf16>
    %c0_1 = arith.constant 0 : index
    %c0_2 = arith.constant 0 : index
    %1 = vector.load %arg2[%c0_1, %c0_2] : memref<128x128xbf16, #tpu.memory_space<vmem>>, vector<128x128xbf16>
    %cst = arith.constant dense<0.000000e+00> : vector<128x128xf32>
    %2 = tpu.matmul %0, %1, %cst {dimension_numbers = #tpu.dot_dimension_numbers<[1], [0], [0], [1], [0, 0, 1, 1], [], []>} : vector<128x128xbf16>, vector<128x128xbf16>, vector<128x128xf32> -> vector<128x128xf32>
    %c0_3 = arith.constant 0 : index
    %c0_4 = arith.constant 0 : index
    %3 = vector.load %arg3[%c0_3, %c0_4] : memref<1x128xf32, #tpu.memory_space<vmem>>, vector<1x128xf32>
    %4 = vector.broadcast %3 : vector<1x128xf32> to vector<128x128xf32>
    %5 = arith.addf %2, %4 : vector<128x128xf32>
    %cst_5 = arith.constant 0.000000e+00 : f32
    %6 = vector.broadcast %cst_5 : f32 to vector<128x128xf32>
    %7 = arith.maximumf %5, %6 : vector<128x128xf32>
    %8 = arith.truncf %7 : vector<128x128xf32> to vector<128x128xbf16>
    %c0_6 = arith.constant 0 : index
    %c0_7 = arith.constant 0 : index
    %9 = vector.load %arg4[%c0_6, %c0_7] : memref<128x128xbf16, #tpu.memory_space<vmem>>, vector<128x128xbf16>
    %cst_8 = arith.constant dense<0.000000e+00> : vector<128x128xf32>
    %10 = tpu.matmul %8, %9, %cst_8 {dimension_numbers = #tpu.dot_dimension_numbers<[1], [0], [0], [1], [0, 0, 1, 1], [], []>} : vector<128x128xbf16>, vector<128x128xbf16>, vector<128x128xf32> -> vector<128x128xf32>
    %c0_9 = arith.constant 0 : index
    %c0_10 = arith.constant 0 : index
    %11 = vector.load %arg5[%c0_9, %c0_10] : memref<1x128xf32, #tpu.memory_space<vmem>>, vector<1x128xf32>
    %12 = vector.broadcast %11 : vector<1x128xf32> to vector<128x128xf32>
    %13 = arith.addf %10, %12 : vector<128x128xf32>
    %cst_11 = arith.constant 0.000000e+00 : f32
    %14 = vector.broadcast %cst_11 : f32 to vector<128x128xf32>
    %15 = arith.maximumf %13, %14 : vector<128x128xf32>
    %c0_12 = arith.constant 0 : index
    %c0_13 = arith.constant 0 : index
    %16 = vector.load %arg6[%c0_12, %c0_13] : memref<1x128xbf16, #tpu.memory_space<vmem>>, vector<1x128xbf16>
    %17 = arith.truncf %15 : vector<128x128xf32> to vector<128x128xbf16>
    %cst_14 = arith.constant dense<0.000000e+00> : vector<1x128xf32>
    %18 = tpu.matmul %16, %17, %cst_14 {dimension_numbers = #tpu.dot_dimension_numbers<[1], [1], [0], [0], [0, 0, 1, 0], [], []>} : vector<1x128xbf16>, vector<128x128xbf16>, vector<1x128xf32> -> vector<1x128xf32>
    %c0_15 = arith.constant 0 : index
    %c0_16 = arith.constant 0 : index
    %19 = memref.load %arg7[%c0_15, %c0_16] : memref<1x1xf32, #tpu.memory_space<smem>>
    %20 = vector.broadcast %19 : f32 to vector<1x128xf32>
    %21 = arith.addf %18, %20 : vector<1x128xf32>
    %c0_17 = arith.constant 0 : index
    %c0_18 = arith.constant 0 : index
    %22 = vector.load %arg8[%c0_17, %c0_18] : memref<1x128xf32, #tpu.memory_space<vmem>>, vector<1x128xf32>
    tpu.vector_store %arg8[%c0_17, %c0_18], %21 {strides = array<i32>} : memref<1x128xf32, #tpu.memory_space<vmem>>, vector<1x128xf32>,
    return
  }
  func.func @transform_0(%arg0: i32) -> (i32, i32) {
    %c0_i32 = arith.constant 0 : i32
    %c0_i32_0 = arith.constant 0 : i32
    return %arg0, %c0_i32 : i32, i32
  }
  func.func @transform_1(%arg0: i32) -> (i32, i32) {
    %c0_i32 = arith.constant 0 : i32
    %c0_i32_0 = arith.constant 0 : i32
    %c0_i32_1 = arith.constant 0 : i32
    return %c0_i32, %c0_i32_0 : i32, i32
  }
  func.func @transform_2(%arg0: i32) -> (i32, i32) {
    %c0_i32 = arith.constant 0 : i32
    %c0_i32_0 = arith.constant 0 : i32
    %c0_i32_1 = arith.constant 0 : i32
    return %c0_i32, %c0_i32_0 : i32, i32
  }
  func.func @transform_3(%arg0: i32) -> (i32, i32) {
    %c0_i32 = arith.constant 0 : i32
    %c0_i32_0 = arith.constant 0 : i32
    %c0_i32_1 = arith.constant 0 : i32
    return %c0_i32, %c0_i32_0 : i32, i32
  }
  func.func @transform_4(%arg0: i32) -> (i32, i32) {
    %c0_i32 = arith.constant 0 : i32
    %c0_i32_0 = arith.constant 0 : i32
    %c0_i32_1 = arith.constant 0 : i32
    return %c0_i32, %c0_i32_0 : i32, i32
  }
  func.func @transform_5(%arg0: i32) -> (i32, i32) {
    %c0_i32 = arith.constant 0 : i32
    %c0_i32_0 = arith.constant 0 : i32
    %c0_i32_1 = arith.constant 0 : i32
    return %c0_i32, %c0_i32_0 : i32, i32
  }
  func.func @transform_6(%arg0: i32) -> (i32, i32) {
    %c0_i32 = arith.constant 0 : i32
    %c0_i32_0 = arith.constant 0 : i32
    %c0_i32_1 = arith.constant 0 : i32
    return %c0_i32, %c0_i32_0 : i32, i32
  }
  func.func @transform_7(%arg0: i32) -> (i32, i32) {
    %c0_i32 = arith.constant 0 : i32
    %c0_i32_0 = arith.constant 0 : i32
    return %arg0, %c0_i32 : i32, i32
  }
}

</mosaic_0001>

<bundles_post_ra>
// kernel: value_network_forward.1
= control target key start
LH: loop header
LB: loop body
LE: loop exit
PB: predicated region body
PF: predicated region fallthrough
CT: control target
= control target key end

     0   :  { %vm702_vm0 = vmmov 0   ;;  %s839_s1 = inlined_call_operand.vmem [shape: bf16[128,128], index: 1, kind: input, shape index: {}]   ;;  %s840_s0 = inlined_call_operand.vmem [shape: bf16[128,128], index: 0, kind: input, shape index: {}]   ;;  %s841_s3 = inlined_call_operand.vmem [shape: bf16[128,128], index: 3, kind: input, shape index: {}]   ;;  %s842_s2 = inlined_call_operand.vmem [shape: f32[1,128], index: 2, kind: input, shape index: {}]   ;;  %s843_s4 = inlined_call_operand.vmem [shape: f32[1,128], index: 4, kind: input, shape index: {}]   ;;  %s844_s5 = inlined_call_operand.vmem [shape: bf16[1,128], index: 5, kind: input, shape index: {}]   ;;  %s845_s6 = inlined_call_operand.<no memory space> [shape: f32[1,1], index: 6, kind: input, shape index: {}]   ;;  %s846_s7 = inlined_call_operand.vmem [shape: f32[1,128], index: 7, kind: output, shape index: {}]  }
   0x1   :  { %v677_v0 = vld [vmem:[%s839_s1] sm:$0xff]   ;;  %v678_v1 = vld [vmem:[%s839_s1 + $0x8] sm:$0xff]   ;;  %v679_v2 = vld [vmem:[%s839_s1 + $0x10] sm:$0xff]  }
   0x2   :  { %591 = vmatprep.subr.bf16.mxu1 %v677_v0  ;;  %v680_v3 = vld [vmem:[%s839_s1 + $0x18] sm:$0xff]   ;;  %v685_v4 = vld [vmem:[%s840_s0] sm:$0xff]   ;;  %v682_v6 = vld [vmem:[%s839_s1 + $0x28] sm:$0xff]  }
   0x3   :  { %592 = vmatpush3.bf16.msra.mxu1 %v677_v0  ;;  %607 = vmatprep.mubr.bf16.mxu1 %v685_v4  ;;  %v681_v5 = vld [vmem:[%s839_s1 + $0x20] sm:$0xff]   ;;  %v683_v7 = vld [vmem:[%s839_s1 + $0x30] sm:$0xff]   ;;  %v684_v8 = vld [vmem:[%s839_s1 + $0x38] sm:$0xff]  }
   0x4   :  { %593 = vmatprep.subr.bf16.mxu1 %v678_v1  ;;  %v693_v9 = vld [vmem:[%s841_s3] sm:$0xff]   ;;  %v686_v10 = vld [vmem:[%s840_s0 + $0x8] sm:$0xff]   ;;  %v687_v11 = vld [vmem:[%s840_s0 + $0x10] sm:$0xff]  }
   0x5   :  { %v694_v12 = vld [vmem:[%s841_s3 + $0x8] sm:$0xff]   ;;  %v695_v13 = vld [vmem:[%s841_s3 + $0x10] sm:$0xff]   ;;  %v688_v14 = vld [vmem:[%s840_s0 + $0x18] sm:$0xff]  }
   0x6   :  { %v689_v15 = vld [vmem:[%s840_s0 + $0x20] sm:$0xff]   ;;  %v696_v16 = vld [vmem:[%s841_s3 + $0x18] sm:$0xff]   ;;  %v690_v18 = vld [vmem:[%s840_s0 + $0x28] sm:$0xff]  }
   0x7   :  { %594 = vmatpush3.bf16.msra.mxu1 %v678_v1  ;;  %v697_v17 = vld [vmem:[%s841_s3 + $0x20] sm:$0xff]   ;;  %v691_v19 = vld [vmem:[%s840_s0 + $0x30] sm:$0xff]   ;;  %v698_v20 = vld [vmem:[%s841_s3 + $0x28] sm:$0xff]  }
   0x8   :  { %595 = vmatprep.subr.bf16.mxu1 %v679_v2  ;;  %v692_v21 = vld [vmem:[%s840_s0 + $0x38] sm:$0xff]   ;;  %v699_v22 = vld [vmem:[%s841_s3 + $0x30] sm:$0xff]   ;;  %v524_v24 = vld [vmem:[%s842_s2] ss:$0 sm:$0xff] }
   0x9   :  { %v700_v23 = vld [vmem:[%s841_s3 + $0x38] sm:$0xff]  }
   0xb   :  { %596 = vmatpush3.bf16.msra.mxu1 %v679_v2 }
   0xc   :  { %597 = vmatprep.subr.bf16.mxu1 %v680_v3 }
   0xf   :  { %598 = vmatpush3.bf16.msra.mxu1 %v680_v3 }
  0x10   :  { %599 = vmatprep.subr.bf16.mxu1 %v681_v5 }
  0x13   :  { %600 = vmatpush3.bf16.msra.mxu1 %v681_v5 }
  0x14   :  { %601 = vmatprep.subr.bf16.mxu1 %v682_v6 }
  0x17   :  { %602 = vmatpush3.bf16.msra.mxu1 %v682_v6 }
  0x18   :  { %603 = vmatprep.subr.bf16.mxu1 %v683_v7 }
  0x1b   :  { %604 = vmatpush3.bf16.msra.mxu1 %v683_v7 }
  0x1c   :  { %605 = vmatprep.subr.bf16.mxu1 %v684_v8 }
  0x1f   :  { %606 = vmatpush3.bf16.msra.mxu1 %v684_v8 }
  0x20   :  { %623 = vmatprep.subr.bf16.mxu1 %v693_v9 }
  0x22   :  { %608 = vmatmul.mubr.bf16.vlgmr.msra.gmra.mrb[0].mxu1 %v686_v10 }
  0x23   :  { %611 = vmatprep.mubr.bf16.mxu1 %v687_v11  ;;  %624 = vmatpush3.bf16.msra.mxu1 %v693_v9 }
  0x24   :  { %625 = vmatprep.subr.bf16.mxu1 %v694_v12 }
  0x27   :  { %626 = vmatpush3.bf16.msra.mxu1 %v694_v12 }
  0x28   :  { %627 = vmatprep.subr.bf16.mxu1 %v695_v13 }
  0x2a   :  { %612 = vmatmul.mubr.bf16.gmra.mrb[4].mxu1 %v688_v14 }
  0x2b   :  { %615 = vmatprep.mubr.bf16.mxu1 %v689_v15  ;;  %628 = vmatpush3.bf16.msra.mxu1 %v695_v13 }
  0x2c   :  { %629 = vmatprep.subr.bf16.mxu1 %v696_v16 }
  0x2f   :  { %630 = vmatpush3.bf16.msra.mxu1 %v696_v16 }
  0x30   :  { %631 = vmatprep.subr.bf16.mxu1 %v697_v17 }
  0x32   :  { %616 = vmatmul.mubr.bf16.gmra.mrb[8].mxu1 %v690_v18  ;;  %v541_v18 = vld [vmem:[%s843_s4] ss:$0 sm:$0xff] }
  0x33   :  { %619 = vmatprep.mubr.bf16.mxu1 %v691_v19  ;;  %632 = vmatpush3.bf16.msra.mxu1 %v697_v17  ;;  %v701_v17 = vmov 0.0  }
  0x34   :  { %633 = vmatprep.subr.bf16.mxu1 %v698_v20  ;;  %655 = vmatprep.subr.bf16.mxu0 %v701_v17 }
  0x35   :  { %671 = vmatprep.mubr.msk.bf16.mxu0 %vm702_vm0, %v701_v17 }
  0x37   :  { %634 = vmatpush3.bf16.msra.mxu1 %v698_v20 }
  0x38   :  { %635 = vmatprep.subr.bf16.mxu1 %v699_v22 }
  0x3a   :  { %620 = vmatmul.mubr.bf16.gmra.mrb[12].mxu1 %v692_v21 }
  0x3b   :  { %636 = vmatpush3.bf16.msra.mxu1 %v699_v22 }
  0x3c   :  { %637 = vmatprep.subr.bf16.mxu1 %v700_v23 }
  0x3f   :  { %638 = vmatpush3.bf16.msra.mxu1 %v700_v23 }
  0xf5   :  { %v609_v25 = vpop.f32.mrb[0].mxu1 }
  0xf6   :  { %v206_v26 = vadd.f32 %v609_v25, %v524_v24  ;;  %v197_v27 = vpop.f32.mrb[1].mxu1 }
  0xf7   :  { %v198_v28 = vadd.f32 %v524_v24, %v197_v27  ;;  %v610_v29 = vpop.f32.mrb[2].mxu1 }
  0xf8   :  { %v209_v30 = vadd.f32 %v610_v29, %v524_v24  ;;  %v200_v31 = vpop.f32.mrb[3].mxu1  ;;  %v262_v33 = vmax.f32 %v206_v26, 0.0 }
  0xf9   :  { %v201_v32 = vadd.f32 %v524_v24, %v200_v31  ;;  %v260_v35 = vmax.f32 %v198_v28, 0.0 }
  0xfa   :  { %v263_v34 = vmax.f32 %v209_v30, 0.0 }
  0xfb   :  { %v261_v36 = vmax.f32 %v201_v32, 0.0 }
  0xfc   :  { %v277_v37 = vpack.c.bf16 %v263_v34, %v262_v33 }
  0xfd   :  { %v276_v38 = vpack.c.bf16 %v261_v36, %v260_v35  ;;  %v613_v39 = vpop.f32.mrb[4].mxu1 }
  0xfe   :  { %v222_v40 = vadd.f32 %v613_v39, %v524_v24  ;;  %v213_v41 = vpop.f32.mrb[5].mxu1 }
  0xff   :  { %v214_v42 = vadd.f32 %v524_v24, %v213_v41  ;;  %639 = vmatprep.mubr.bf16.mxu1 %v276_v38  ;;  %v614_v43 = vpop.f32.mrb[6].mxu1 }
 0x100   :  { %v266_v44 = vmax.f32 %v222_v40, 0.0  ;;  %v225_v45 = vadd.f32 %v614_v43, %v524_v24  ;;  %640 = vmatmul.mubr.bf16.vlgmr.msra.gmra.mrb[16].mxu1 %v277_v37  ;;  %v216_v46 = vpop.f32.mrb[7].mxu1 }
 0x101   :  { %v264_v47 = vmax.f32 %v214_v42, 0.0  ;;  %v217_v48 = vadd.f32 %v524_v24, %v216_v46 }
 0x102   :  { %v267_v49 = vmax.f32 %v225_v45, 0.0 }
 0x103   :  { %v265_v50 = vmax.f32 %v217_v48, 0.0 }
 0x104   :  { %v279_v51 = vpack.c.bf16 %v267_v49, %v266_v44 }
 0x105   :  { %v278_v52 = vpack.c.bf16 %v265_v50, %v264_v47  ;;  %v617_v53 = vpop.f32.mrb[8].mxu1 }
 0x106   :  { %v238_v54 = vadd.f32 %v617_v53, %v524_v24  ;;  %v229_v55 = vpop.f32.mrb[9].mxu1 }
 0x107   :  { %643 = vmatprep.mubr.bf16.mxu1 %v278_v52  ;;  %v230_v56 = vadd.f32 %v524_v24, %v229_v55  ;;  %v618_v57 = vpop.f32.mrb[10].mxu1 }
 0x108   :  { %644 = vmatmul.mubr.bf16.gmra.mrb[20].mxu1 %v279_v51  ;;  %v270_v58 = vmax.f32 %v238_v54, 0.0  ;;  %v241_v59 = vadd.f32 %v618_v57, %v524_v24  ;;  %v232_v60 = vpop.f32.mrb[11].mxu1 }
 0x109   :  { %v268_v61 = vmax.f32 %v230_v56, 0.0  ;;  %v233_v62 = vadd.f32 %v524_v24, %v232_v60 }
 0x10a   :  { %v271_v63 = vmax.f32 %v241_v59, 0.0 }
 0x10b   :  { %v269_v0 = vmax.f32 %v233_v62, 0.0 }
 0x10c   :  { %v281_v1 = vpack.c.bf16 %v271_v63, %v270_v58 }
 0x10d   :  { %v280_v2 = vpack.c.bf16 %v269_v0, %v268_v61  ;;  %v621_v3 = vpop.f32.mrb[12].mxu1 }
 0x10e   :  { %v254_v4 = vadd.f32 %v621_v3, %v524_v24  ;;  %v245_v5 = vpop.f32.mrb[13].mxu1 }
 0x10f   :  { %647 = vmatprep.mubr.bf16.mxu1 %v280_v2  ;;  %v246_v6 = vadd.f32 %v524_v24, %v245_v5  ;;  %v622_v7 = vpop.f32.mrb[14].mxu1 }
 0x110   :  { %648 = vmatmul.mubr.bf16.gmra.mrb[24].mxu1 %v281_v1  ;;  %v274_v8 = vmax.f32 %v254_v4, 0.0  ;;  %v257_v9 = vadd.f32 %v622_v7, %v524_v24  ;;  %v248_v10 = vpop.f32.mrb[15].mxu1 }
 0x111   :  { %v272_v11 = vmax.f32 %v246_v6, 0.0  ;;  %v249_v12 = vadd.f32 %v524_v24, %v248_v10 }
 0x112   :  { %v275_v13 = vmax.f32 %v257_v9, 0.0 }
 0x113   :  { %v273_v14 = vmax.f32 %v249_v12, 0.0  ;;  %v478_v12 = vstv %s845_s6 }
 0x114   :  { %v283_v15 = vpack.c.bf16 %v275_v13, %v274_v8 }
 0x115   :  { %v282_v16 = vpack.c.bf16 %v273_v14, %v272_v11  ;;  %v468_v11 = vld [vmem:[%s844_s5] sm:$0x1] }
 0x117   :  { %651 = vmatprep.mubr.bf16.mxu1 %v282_v16 }
 0x118   :  { %652 = vmatmul.mubr.bf16.gmra.mrb[28].mxu1 %v283_v15 }
 0x1d3   :  { %v641_v19 = vpop.f32.mrb[16].mxu1 }
 0x1d4   :  { %v398_v20 = vadd.f32 %v641_v19, %v541_v18  ;;  %v389_v21 = vpop.f32.mrb[17].mxu1 }
 0x1d5   :  { %v390_v22 = vadd.f32 %v541_v18, %v389_v21  ;;  %v642_v23 = vpop.f32.mrb[18].mxu1 }
 0x1d6   :  { %v401_v24 = vadd.f32 %v642_v23, %v541_v18  ;;  %v392_v25 = vpop.f32.mrb[19].mxu1  ;;  %v454_v27 = vmax.f32 %v398_v20, 0.0 }
 0x1d7   :  { %v393_v26 = vadd.f32 %v541_v18, %v392_v25  ;;  %v452_v29 = vmax.f32 %v390_v22, 0.0 }
 0x1d8   :  { %v455_v28 = vmax.f32 %v401_v24, 0.0 }
 0x1d9   :  { %v453_v30 = vmax.f32 %v393_v26, 0.0 }
 0x1da   :  { %v470_v31 = vpack.c.bf16 %v455_v28, %v454_v27 }
 0x1db   :  { %v645_v32 = vpop.f32.mrb[20].mxu1  ;;  %v469_v33 = vpack.c.bf16 %v453_v30, %v452_v29 }
 0x1dc   :  { %v414_v34 = vadd.f32 %v645_v32, %v541_v18  ;;  %v405_v35 = vpop.f32.mrb[21].mxu1 }
 0x1dd   :  { %v406_v36 = vadd.f32 %v541_v18, %v405_v35  ;;  %656 = vmatpush3.bf16.xpose.msra.mxu0 %v469_v33  ;;  %v646_v37 = vpop.f32.mrb[22].mxu1 }
 0x1de   :  { %v458_v38 = vmax.f32 %v414_v34, 0.0  ;;  %v417_v39 = vadd.f32 %v646_v37, %v541_v18  ;;  %v408_v40 = vpop.f32.mrb[23].mxu1  ;;  %657 = vmatprep.subr.bf16.mxu0 %v701_v17 }
 0x1df   :  { %v456_v41 = vmax.f32 %v406_v36, 0.0  ;;  %v409_v42 = vadd.f32 %v541_v18, %v408_v40 }
 0x1e0   :  { %v459_v43 = vmax.f32 %v417_v39, 0.0 }
 0x1e1   :  { %v457_v44 = vmax.f32 %v409_v42, 0.0 }
 0x1e2   :  { %v472_v45 = vpack.c.bf16 %v459_v43, %v458_v38 }
 0x1e3   :  { %v471_v46 = vpack.c.bf16 %v457_v44, %v456_v41  ;;  %v649_v47 = vpop.f32.mrb[24].mxu1 }
 0x1e4   :  { %v430_v48 = vadd.f32 %v649_v47, %v541_v18  ;;  %v421_v49 = vpop.f32.mrb[25].mxu1 }
 0x1e5   :  { %658 = vmatpush3.bf16.xpose.msra.mxu0 %v470_v31  ;;  %v422_v50 = vadd.f32 %v541_v18, %v421_v49  ;;  %v650_v51 = vpop.f32.mrb[26].mxu1 }
 0x1e6   :  { %v462_v52 = vmax.f32 %v430_v48, 0.0  ;;  %659 = vmatprep.subr.bf16.mxu0 %v701_v17  ;;  %v433_v53 = vadd.f32 %v650_v51, %v541_v18  ;;  %v424_v54 = vpop.f32.mrb[27].mxu1 }
 0x1e7   :  { %v460_v55 = vmax.f32 %v422_v50, 0.0  ;;  %v425_v56 = vadd.f32 %v541_v18, %v424_v54 }
 0x1e8   :  { %v463_v57 = vmax.f32 %v433_v53, 0.0 }
 0x1e9   :  { %v461_v58 = vmax.f32 %v425_v56, 0.0 }
 0x1ea   :  { %v474_v59 = vpack.c.bf16 %v463_v57, %v462_v52 }
 0x1eb   :  { %v473_v60 = vpack.c.bf16 %v461_v58, %v460_v55  ;;  %v653_v61 = vpop.f32.mrb[28].mxu1 }
 0x1ec   :  { %v446_v62 = vadd.f32 %v653_v61, %v541_v18  ;;  %v437_v63 = vpop.f32.mrb[29].mxu1 }
 0x1ed   :  { %660 = vmatpush3.bf16.xpose.msra.mxu0 %v471_v46  ;;  %v438_v0 = vadd.f32 %v541_v18, %v437_v63  ;;  %v654_v1 = vpop.f32.mrb[30].mxu1 }
 0x1ee   :  { %661 = vmatprep.subr.bf16.mxu0 %v701_v17  ;;  %v466_v2 = vmax.f32 %v446_v62, 0.0  ;;  %v449_v3 = vadd.f32 %v654_v1, %v541_v18  ;;  %v440_v4 = vpop.f32.mrb[31].mxu1 }
 0x1ef   :  { %v464_v5 = vmax.f32 %v438_v0, 0.0  ;;  %v441_v6 = vadd.f32 %v541_v18, %v440_v4 }
 0x1f0   :  { %v467_v7 = vmax.f32 %v449_v3, 0.0 }
 0x1f1   :  { %v465_v8 = vmax.f32 %v441_v6, 0.0 }
 0x1f2   :  { %v476_v9 = vpack.c.bf16 %v467_v7, %v466_v2 }
 0x1f3   :  { %v475_v10 = vpack.c.bf16 %v465_v8, %v464_v5 }
 0x1f5   :  { %662 = vmatpush3.bf16.xpose.msra.mxu0 %v472_v45 }
 0x1f6   :  { %663 = vmatprep.subr.bf16.mxu0 %v701_v17 }
 0x1fd   :  { %664 = vmatpush3.bf16.xpose.msra.mxu0 %v473_v60 }
 0x1fe   :  { %665 = vmatprep.subr.bf16.mxu0 %v701_v17 }
 0x205   :  { %666 = vmatpush3.bf16.xpose.msra.mxu0 %v474_v59 }
 0x206   :  { %667 = vmatprep.subr.bf16.mxu0 %v701_v17 }
 0x20d   :  { %668 = vmatpush3.bf16.xpose.msra.mxu0 %v475_v10 }
 0x20e   :  { %669 = vmatprep.subr.bf16.mxu0 %v701_v17 }
 0x215   :  { %670 = vmatpush3.bf16.xpose.msra.mxu0 %v476_v9 }
 0x21c   :  { %672 = vmatmul.mubr.bf16.vlgmr.msra.gmra.mrb[0].mxu0 %v468_v11 }
 0x2ef   :  { %v513_v13 = vpop.f32.mrb[0].mxu0 }
 0x2f0   :  { %v514_v14 = vadd.f32 %v513_v13, %v478_v12  ;;  %v673_v15 = vpop.f32.mrb[1].mxu0 }
 0x2f1   :  { %v516_v16 = vpop.f32.mrb[2].mxu0 }
 0x2f2   :  { %519 = vst [vmem:[%s846_s7] sm:$0x1] %v514_v14  ;;  %v674_v18 = vpop.f32.mrb[3].mxu0 }

</bundles_post_ra>
